<compile_context>
chip_gen: v5e
topology: v5e:2x2
jax: 0.10.0
libtpu: 0.0.40
codegen_flags: <defaults>
</compile_context>

<pallas_src>
import math

import numpy as np
import jax
import jax.numpy as jnp
from jax.experimental import pallas as pl
from jax.experimental.pallas import tpu as pltpu

# ---- CheapTrick config (scaled down so shapes stay small; the CheapTrick
# ---- constraint fft_size > 3 * sample_rate / f0_floor holds: 128 > 102.9).
SAMPLE_RATE = 2400
HOP_SIZE = 30
FFT_SIZE = 128
F0_FLOOR = 70
F0_CEIL = 340
Q1 = -0.15
UV_THRESHOLD = 0.0

N = FFT_SIZE
K = FFT_SIZE // 2 + 1          # 65 "real" bins
KPAD = 128                     # lane-dense padded bin count


def _round_up(x, m):
    return ((x + m - 1) // m) * m


def build_tables():
    """Deterministic CheapTrick buffers + DFT bases (no learned parameters)."""
    # Adaptive window table (f0_ceil + 1, N) -- same construction as AdaptiveWindowing.
    win = np.zeros((F0_CEIL + 1, N), dtype=np.float64)
    for f0 in range(F0_FLOOR, F0_CEIL + 1):
        half = round(1.5 * SAMPLE_RATE / f0)
        base = np.arange(-half, half + 1, dtype=np.float64)
        pos = base / 1.5 / SAMPLE_RATE
        w = np.zeros(N, dtype=np.float64)
        left, right = N // 2 - half, N // 2 + half + 1
        w[left:right] = 0.5 * np.cos(math.pi * pos * f0) + 0.5
        win[f0] = w / np.sqrt(np.sum(w * w))

    # Merged lifter = smoothing * compensation, zero-padded to KPAD.
    q0 = 1.0 - 2.0 * Q1
    lifter = np.zeros((F0_CEIL + 1, KPAD), dtype=np.float64)
    quef = np.arange(1, K, dtype=np.float64) / SAMPLE_RATE
    for f0 in range(F0_FLOOR, F0_CEIL + 1):
        smooth = np.empty(K, dtype=np.float64)
        comp = np.empty(K, dtype=np.float64)
        smooth[0] = 1.0
        smooth[1:] = np.sin(math.pi * f0 * quef) / (math.pi * f0 * quef)
        comp[0] = q0 + 2.0 * Q1
        comp[1:] = q0 + 2.0 * Q1 * np.cos(2.0 * math.pi * f0 * quef)
        lifter[f0, :K] = smooth * comp

    # Fused rfft basis: columns [0:K] = cos, [KPAD:KPAD+K] = sin, zeros elsewhere.
    n = np.arange(N)[:, None]
    k = np.arange(K)[None, :]
    ang = 2.0 * math.pi * n * k / N
    dft = np.zeros((N, 2 * KPAD), dtype=np.float64)
    dft[:, :K] = np.cos(ang)
    dft[:, KPAD:KPAD + K] = np.sin(ang)

    # Real cepstrum of the even-symmetric log spectrum (zero-padded to KPAD x KPAD):
    #   C[k] = sum_n w(n) * log|X|[n] * cos(2*pi*n*k/N),  w = 1 at n in {0, N/2}, else 2.
    # The 0.5 of log|X| = 0.5*log(power) is folded into this table (kernel feeds
    # log(power + eps) directly).
    nn = np.arange(K)[:, None]
    kk = np.arange(K)[None, :]
    wgt_n = np.where((nn == 0) | (nn == N // 2), 1.0, 2.0)
    symcos = np.zeros((KPAD, KPAD), dtype=np.float64)
    symcos[:K, :K] = 0.5 * wgt_n * np.cos(2.0 * math.pi * nn * kk / N)

    # irfft of a real K-vector, first K output samples (zero-padded to KPAD x KPAD):
    #   e[m] = (1/N) * sum_k w(k) * C[k] * cos(2*pi*k*m/N).
    kc = np.arange(K)[:, None]
    mm = np.arange(K)[None, :]
    wgt_k = np.where((kc == 0) | (kc == N // 2), 1.0, 2.0)
    icos = np.zeros((KPAD, KPAD), dtype=np.float64)
    icos[:K, :K] = (wgt_k * np.cos(2.0 * math.pi * kc * mm / N)) / N

    return (jnp.asarray(win, dtype=jnp.float32),          # window table (wrapper-side only)
            jnp.asarray(lifter, dtype=jnp.bfloat16),      # merged lifter (bf16 stream)
            jnp.asarray(dft, dtype=jnp.bfloat16),         # fused cos|sin rfft basis (bf16)
            jnp.asarray(symcos, dtype=jnp.bfloat16),      # 0.5 * symmetric-cos (bf16)
            jnp.asarray(icos, dtype=jnp.bfloat16))        # irfft cos basis (bf16)


def _flatten_loss_kernel(xw_ref, lifter_ref, dft_ref, symcos_ref, icos_ref, out_ref):
    # Step 1: fused rfft (Re|Im): one (TILE_M,128)x(128,256) bf16 MXU matmul, f32 acc.
    xri = jnp.dot(xw_ref[...], dft_ref[...], preferred_element_type=jnp.float32)
    xc = xri[:, :KPAD]
    xs = xri[:, KPAD:]

    # 2*log|X| = log(Re^2 + Im^2 + eps); the 0.5 is pre-folded into symcos.
    logspec = jnp.log(xc * xc + xs * xs + 1e-14)                          # (TILE_M, KPAD)

    # Step 2: adaptive liftering in the cepstral domain, bf16 operands / f32 acc
    # (padded rows/cols of symcos/icos are zero => no numeric leak).
    cep = jnp.dot(logspec.astype(jnp.bfloat16), symcos_ref[...],
                  preferred_element_type=jnp.float32)                     # (TILE_M, KPAD)
    lift = (cep * lifter_ref[...]).astype(jnp.bfloat16)                   # elim_0th=False
    env = jnp.dot(lift, icos_ref[...], preferred_element_type=jnp.float32)

    # Step 3: partial L1 sums reduced over sublane groups only (pure VPU adds, no
    # cross-lane XLU reduce); lane-dense (1, 8, 128) block per grid step.
    absenv = jnp.abs(env)
    tm = absenv.shape[0]
    partial = jnp.sum(absenv.reshape(tm // 8, 8, KPAD), axis=0)           # (8, KPAD)
    out_ref[...] = partial[None].astype(jnp.float32)


def flatten_loss(s, f, tables):
    """s: (B, 1, T) waveform, f: (B, 1, T // HOP_SIZE) F0 sequence."""
    win_tbl, lifter_tbl, dft, symcos, icos = tables

    s = s[:, 0, :].astype(jnp.float32)      # (B, T)
    f = f[:, 0, :].astype(jnp.float32)      # (B, T')
    B = s.shape[0]
    Tp = f.shape[1]
    M = B * Tp

    # F0 -> integer table indices (unvoiced -> f0_ceil, clamp, round).
    voiced = f > UV_THRESHOLD
    f0 = jnp.where(voiced, f, float(F0_CEIL))
    f0 = jnp.round(jnp.clip(f0, F0_FLOOR, F0_CEIL)).astype(jnp.int32)
    f0_flat = f0.reshape(M)

    # Centered frames of length N with hop HOP_SIZE (matches ConstantPad2d + unfold),
    # with the F0-adaptive window fused in -> a single bf16 tiled kernel input.
    # TODO(synk): assemble frames in-kernel from a raw waveform slab (pl.ANY + DMA)
    # and gather window/lifter rows from resident VMEM tables via scalar-prefetched
    # f0 indices, eliminating these wrapper-side (M, 128) materializations.
    pad = N // 2
    s_pad = jnp.pad(s, ((0, 0), (pad, pad)))
    idx = jnp.arange(Tp)[:, None] * HOP_SIZE + jnp.arange(N)[None, :]     # (T', N)
    frames = s_pad[:, idx].reshape(M, N)                                  # (M, N)  f32
    xw = (frames * win_tbl[f0_flat]).astype(jnp.bfloat16)                 # (M, N)  bf16
    lifter = lifter_tbl[f0_flat]                                          # (M, KPAD) bf16

    # Tile M (rows are independent frames). Pad to a multiple of TILE_M with zero
    # lifter rows (=> exactly zero contribution). Ensure >=2 grid steps when
    # possible so the "parallel" axis can be sharded across v7x's 2 TensorCores.
    TILE_M = min(2048, _round_up(M, 8))
    if _round_up(M, TILE_M) // TILE_M < 2 and TILE_M > 8:
        TILE_M = max(8, _round_up(TILE_M // 2, 8))
    M_pad = _round_up(M, TILE_M)
    num_tiles = M_pad // TILE_M
    if M_pad > M:
        padr = M_pad - M
        xw = jnp.pad(xw, ((0, padr), (0, 0)))
        lifter = jnp.pad(lifter, ((0, padr), (0, 0)))

    # Explicit VMEM budget: double-buffered tiles + resident tables + f32 temps.
    in_tile_bytes = TILE_M * N * 2 + TILE_M * KPAD * 2        # xw + lifter (bf16)
    table_bytes = N * (2 * KPAD) * 2 + 2 * KPAD * KPAD * 2    # dft + symcos + icos (bf16)
    out_bytes = 8 * KPAD * 4
    interm_bytes = 8 * TILE_M * KPAD * 4                      # generous f32 temp budget
    vmem_limit = 2 * (in_tile_bytes + table_bytes + out_bytes) + interm_bytes + (8 << 20)
    vmem_limit = int(min(max(vmem_limit, 16 << 20), 48 << 20))

    partials = pl.pallas_call(
        _flatten_loss_kernel,
        out_shape=jax.ShapeDtypeStruct((num_tiles, 8, KPAD), jnp.float32),
        grid_spec=pltpu.PrefetchScalarGridSpec(
            num_scalar_prefetch=0,
            grid=(num_tiles,),
            in_specs=[
                pl.BlockSpec((TILE_M, N), lambda i: (i, 0)),        # windowed frames (tiled)
                pl.BlockSpec((TILE_M, KPAD), lambda i: (i, 0)),     # merged lifter   (tiled)
                pl.BlockSpec((N, 2 * KPAD), lambda i: (0, 0)),      # fused rfft basis (resident)
                pl.BlockSpec((KPAD, KPAD), lambda i: (0, 0)),       # 0.5*symcos       (resident)
                pl.BlockSpec((KPAD, KPAD), lambda i: (0, 0)),       # icos             (resident)
            ],
            out_specs=pl.BlockSpec((1, 8, KPAD), lambda i: (i, 0, 0)),
        ),
        compiler_params=pltpu.CompilerParams(
            dimension_semantics=("parallel",),
            vmem_limit_bytes=vmem_limit,
        ),
    )(xw, lifter, dft, symcos, icos)

    # nn.L1Loss(reduction="mean") over the un-padded (M, K) envelope; padded rows
    # and padded bins contribute exactly 0 (zero lifter rows / zero icos columns).
    return jnp.sum(partials) / float(M * K)


if __name__ == "__main__":
    key = jax.random.PRNGKey(0)
    B, T = 2, 240
    Tp = T // HOP_SIZE  # 8 frames

    k1, k2, k3 = jax.random.split(key, 3)
    s = 0.5 * jax.random.normal(k1, (B, 1, T), dtype=jnp.float32)
    f = jax.random.uniform(k2, (B, 1, Tp), minval=60.0, maxval=400.0, dtype=jnp.float32)
    uv = jax.random.bernoulli(k3, 0.25, (B, 1, Tp))
    f = jnp.where(uv, 0.0, f)   # some unvoiced frames (F0 == 0)

    tables = build_tables()
    loss = jax.jit(lambda s_, f_: flatten_loss(s_, f_, tables))(s, f)
    jax.block_until_ready(loss)
    assert loss.shape == () and jnp.isfinite(loss)
    print("KERNEL_OK")
</pallas_src>

<mosaic_0001>
module attributes {stable_mosaic.version = 11 : i64} {
  func.func @_flatten_loss_kernel(%arg0: i32, %arg1: memref<8x128xbf16, #tpu.memory_space<vmem>>, %arg2: memref<8x128xbf16, #tpu.memory_space<vmem>>, %arg3: memref<128x256xbf16, #tpu.memory_space<vmem>>, %arg4: memref<128x128xbf16, #tpu.memory_space<vmem>>, %arg5: memref<128x128xbf16, #tpu.memory_space<vmem>>, %arg6: memref<1x8x128xf32, #tpu.memory_space<vmem>>) attributes {dimension_semantics = [#tpu.dimension_semantics<parallel>], iteration_bounds = array<i64: 2>, scalar_prefetch = 0 : i64, scratch_operands = 0 : i64, tpu.core_type = #tpu.core_type<tc>, window_params = [{transform_indices = @transform_0, window_bounds = array<i64: 8, 128>}, {transform_indices = @transform_1, window_bounds = array<i64: 8, 128>}, {pipeline_mode = #tpu.pipeline_mode<synchronous>, transform_indices = @transform_2, window_bounds = array<i64: 128, 256>}, {pipeline_mode = #tpu.pipeline_mode<synchronous>, transform_indices = @transform_3, window_bounds = array<i64: 128, 128>}, {pipeline_mode = #tpu.pipeline_mode<synchronous>, transform_indices = @transform_4, window_bounds = array<i64: 128, 128>}, {transform_indices = @transform_5, window_bounds = array<i64: 1, 8, 128>}]} {
    %c0 = arith.constant 0 : index
    %c0_0 = arith.constant 0 : index
    %0 = vector.load %arg1[%c0, %c0_0] : memref<8x128xbf16, #tpu.memory_space<vmem>>, vector<8x128xbf16>
    %c0_1 = arith.constant 0 : index
    %c0_2 = arith.constant 0 : index
    %1 = vector.load %arg3[%c0_1, %c0_2] : memref<128x256xbf16, #tpu.memory_space<vmem>>, vector<128x256xbf16>
    %cst = arith.constant dense<0.000000e+00> : vector<8x256xf32>
    %2 = tpu.matmul %0, %1, %cst {dimension_numbers = #tpu.dot_dimension_numbers<[1], [0], [0], [1], [0, 0, 1, 1], [], []>} : vector<8x128xbf16>, vector<128x256xbf16>, vector<8x256xf32> -> vector<8x256xf32>
    %3 = vector.extract_strided_slice %2 {offsets = [0, 0], sizes = [8, 128], strides = [1, 1]} : vector<8x256xf32> to vector<8x128xf32>
    %4 = vector.extract_strided_slice %2 {offsets = [0, 128], sizes = [8, 128], strides = [1, 1]} : vector<8x256xf32> to vector<8x128xf32>
    %5 = arith.mulf %3, %3 : vector<8x128xf32>
    %6 = arith.mulf %4, %4 : vector<8x128xf32>
    %7 = arith.addf %5, %6 : vector<8x128xf32>
    %cst_3 = arith.constant 9.99999982E-15 : f32
    %8 = vector.broadcast %cst_3 : f32 to vector<8x128xf32>
    %9 = arith.addf %7, %8 : vector<8x128xf32>
    %10 = math.log %9 : vector<8x128xf32>
    %11 = arith.truncf %10 : vector<8x128xf32> to vector<8x128xbf16>
    %c0_4 = arith.constant 0 : index
    %c0_5 = arith.constant 0 : index
    %12 = vector.load %arg4[%c0_4, %c0_5] : memref<128x128xbf16, #tpu.memory_space<vmem>>, vector<128x128xbf16>
    %cst_6 = arith.constant dense<0.000000e+00> : vector<8x128xf32>
    %13 = tpu.matmul %11, %12, %cst_6 {dimension_numbers = #tpu.dot_dimension_numbers<[1], [0], [0], [1], [0, 0, 1, 1], [], []>} : vector<8x128xbf16>, vector<128x128xbf16>, vector<8x128xf32> -> vector<8x128xf32>
    %c0_7 = arith.constant 0 : index
    %c0_8 = arith.constant 0 : index
    %14 = vector.load %arg2[%c0_7, %c0_8] : memref<8x128xbf16, #tpu.memory_space<vmem>>, vector<8x128xbf16>
    %15 = arith.extf %14 : vector<8x128xbf16> to vector<8x128xf32>
    %16 = arith.mulf %13, %15 : vector<8x128xf32>
    %17 = arith.truncf %16 : vector<8x128xf32> to vector<8x128xbf16>
    %c0_9 = arith.constant 0 : index
    %c0_10 = arith.constant 0 : index
    %18 = vector.load %arg5[%c0_9, %c0_10] : memref<128x128xbf16, #tpu.memory_space<vmem>>, vector<128x128xbf16>
    %cst_11 = arith.constant dense<0.000000e+00> : vector<8x128xf32>
    %19 = tpu.matmul %17, %18, %cst_11 {dimension_numbers = #tpu.dot_dimension_numbers<[1], [0], [0], [1], [0, 0, 1, 1], [], []>} : vector<8x128xbf16>, vector<128x128xbf16>, vector<8x128xf32> -> vector<8x128xf32>
    %20 = math.absf %19 : vector<8x128xf32>
    %21 = vector.shape_cast %20 : vector<8x128xf32> to vector<1x8x128xf32>
    %cst_12 = arith.constant dense<0.000000e+00> : vector<8x128xf32>
    %22 = vector.multi_reduction <add>, %21, %cst_12 [0] : vector<1x8x128xf32> to vector<8x128xf32>
    %23 = vector.shape_cast %22 : vector<8x128xf32> to vector<1x8x128xf32>
    %c0_13 = arith.constant 0 : index
    %c0_14 = arith.constant 0 : index
    %c0_15 = arith.constant 0 : index
    %24 = vector.load %arg6[%c0_13, %c0_14, %c0_15] : memref<1x8x128xf32, #tpu.memory_space<vmem>>, vector<1x8x128xf32>
    tpu.vector_store %arg6[%c0_13, %c0_14, %c0_15], %23 {strides = array<i32>} : memref<1x8x128xf32, #tpu.memory_space<vmem>>, vector<1x8x128xf32>,
    return
  }
  func.func @transform_0(%arg0: i32) -> (i32, i32) {
    %c0_i32 = arith.constant 0 : i32
    %c0_i32_0 = arith.constant 0 : i32
    return %arg0, %c0_i32 : i32, i32
  }
  func.func @transform_1(%arg0: i32) -> (i32, i32) {
    %c0_i32 = arith.constant 0 : i32
    %c0_i32_0 = arith.constant 0 : i32
    return %arg0, %c0_i32 : i32, i32
  }
  func.func @transform_2(%arg0: i32) -> (i32, i32) {
    %c0_i32 = arith.constant 0 : i32
    %c0_i32_0 = arith.constant 0 : i32
    %c0_i32_1 = arith.constant 0 : i32
    return %c0_i32, %c0_i32_0 : i32, i32
  }
  func.func @transform_3(%arg0: i32) -> (i32, i32) {
    %c0_i32 = arith.constant 0 : i32
    %c0_i32_0 = arith.constant 0 : i32
    %c0_i32_1 = arith.constant 0 : i32
    return %c0_i32, %c0_i32_0 : i32, i32
  }
  func.func @transform_4(%arg0: i32) -> (i32, i32) {
    %c0_i32 = arith.constant 0 : i32
    %c0_i32_0 = arith.constant 0 : i32
    %c0_i32_1 = arith.constant 0 : i32
    return %c0_i32, %c0_i32_0 : i32, i32
  }
  func.func @transform_5(%arg0: i32) -> (i32, i32, i32) {
    %c0_i32 = arith.constant 0 : i32
    %c0_i32_0 = arith.constant 0 : i32
    %c0_i32_1 = arith.constant 0 : i32
    return %arg0, %c0_i32, %c0_i32_0 : i32, i32, i32
  }
}

</mosaic_0001>

<bundles_post_ra>
// kernel: _lambda_.1
= control target key start
LH: loop header
LB: loop body
LE: loop exit
PB: predicated region body
PF: predicated region fallthrough
CT: control target
= control target key end

     0   :  { %s811_s18 = smov 0   ;;  %s987_s0 = inlined_call_operand.vmem [shape: bf16[16,128], index: 0, kind: input, shape index: {}]   ;;  %s988_s1 = inlined_call_operand.vmem [shape: bf16[16,128], index: 1, kind: input, shape index: {}]   ;;  %s989_s2 = inlined_call_operand.vmem [shape: bf16[128,256], index: 2, kind: input, shape index: {}]   ;;  %s990_s3 = inlined_call_operand.vmem [shape: bf16[128,128], index: 3, kind: input, shape index: {}]   ;;  %s991_s4 = inlined_call_operand.vmem [shape: bf16[128,128], index: 4, kind: input, shape index: {}]   ;;  %s992_s5 = inlined_call_operand.vmem [shape: f32[2,8,128], index: 5, kind: output, shape index: {}]  }
   0x1 LB: > { %s593_s19 = sadd.s32 4294967295, %s779_s18   ;;  %p597_p0 = scmp.ge.s32.totalorder %s779_s18, 1  ;;  %s779_s18 = sphi %s811_s18, %s15_s18  }
   0x2   : > { %p195_p1 = scmp.lt.s32.totalorder %s779_s18, 3 }
   0x4   : > { %p196_p2 = pnand %p597_p0, %p195_p1 }
   0x5   : > { %p225_p3 = scmp.lt.s32.totalorder (!%p196_p2), %s593_s19, 1 }
   0x6   : > { %199 = sbr.rel (%p196_p2) target bundleno = 465 (0x1d1), region = 40 }
   0xb   : > { %v659_v0 = vld [vmem:[%s989_s2 + $0x70] sm:$0xf]  ;;  %v746_v1 = vld [vmem:[%s989_s2 + $0x74] sm:$0xf0]  ;;  %v745_v2 = vld [vmem:[%s989_s2 + $0x74] sm:$0xf] }
   0xc   : > { %v660_v3 = vor.u32 %v746_v1, %v659_v0  ;;  %v661_v4 = vld [vmem:[%s989_s2 + $0x78] sm:$0xf0]  ;;  %v651_v5 = vld [vmem:[%s989_s2 + $0x60] sm:$0xf]  ;;  %v744_v6 = vld [vmem:[%s989_s2 + $0x64] sm:$0xf0] }
   0xd   : > { %v664_v7 = vor.u32 %v745_v2, %v661_v4  ;;  %v743_v8 = vld [vmem:[%s989_s2 + $0x64] sm:$0xf]  ;;  %v653_v9 = vld [vmem:[%s989_s2 + $0x68] sm:$0xf0]  ;;  %v652_v10 = vor.u32 %v744_v6, %v651_v5  ;;  %v643_v12 = vld [vmem:[%s989_s2 + $0x50] sm:$0xf] }
   0xe   : > { %334 = vmatpush.bf16.msra.mxu0 %v660_v3  ;;  %v656_v11 = vor.u32 %v743_v8, %v653_v9  ;;  %v742_v13 = vld [vmem:[%s989_s2 + $0x54] sm:$0xf0]  ;;  %v741_v14 = vld [vmem:[%s989_s2 + $0x54] sm:$0xf]  ;;  %v645_v15 = vld [vmem:[%s989_s2 + $0x58] sm:$0xf0] }
   0xf   : > { %347 = vmatpush.bf16.msra.mxu1 %v664_v7  ;;  %v644_v16 = vor.u32 %v742_v13, %v643_v12  ;;  %v648_v17 = vor.u32 %v741_v14, %v645_v15  ;;  %v635_v18 = vld [vmem:[%s989_s2 + $0x40] sm:$0xf]  ;;  %v740_v19 = vld [vmem:[%s989_s2 + $0x44] sm:$0xf0]  ;;  %v739_v20 = vld [vmem:[%s989_s2 + $0x44] sm:$0xf] }
  0x10   : > { %v637_v21 = vld [vmem:[%s989_s2 + $0x48] sm:$0xf0]  ;;  %v754_v22 = vld [vmem:[%s990_s3 + $0x38] sm:$0xff]  ;;  %v636_v23 = vor.u32 %v740_v19, %v635_v18  ;;  %v627_v25 = vld [vmem:[%s989_s2 + $0x30] sm:$0xf]  ;;  %s994_s19 = smov (!%p225_p3, %s593_s19), 1 }
  0x11   : > { %v640_v24 = vor.u32 %v739_v20, %v637_v21  ;;  %v738_v26 = vld [vmem:[%s989_s2 + $0x34] sm:$0xf0]  ;;  %431 = vmatpush.bf16.msra.mxu2 %v754_v22  ;;  %v753_v27 = vld [vmem:[%s990_s3 + $0x30] sm:$0xff]  ;;  %v629_v29 = vld [vmem:[%s989_s2 + $0x38] sm:$0xf0]  ;;  %s598_s23 = sshll.u32 %s994_s19, 2 }
  0x12   : > { %335 = vmatpush.bf16.msra.mxu0 %v652_v10  ;;  %v737_v28 = vld [vmem:[%s989_s2 + $0x34] sm:$0xf]  ;;  %v628_v30 = vor.u32 %v738_v26, %v627_v25  ;;  %v619_v32 = vld [vmem:[%s989_s2 + $0x20] sm:$0xf]  ;;  %v736_v33 = vld [vmem:[%s989_s2 + $0x24] sm:$0xf0]  ;;  %s228_s26 = scalar_lea.vmem %s987_s0, %s598_s23  ;;  %s232_s6 = scalar_lea.vmem %s988_s1, %s598_s23 }
  0x13   : > { %348 = vmatpush.bf16.msra.mxu1 %v656_v11  ;;  %v632_v31 = vor.u32 %v737_v28, %v629_v29  ;;  %v752_v34 = vld [vmem:[%s990_s3 + $0x28] sm:$0xff]  ;;  %v735_v35 = vld [vmem:[%s989_s2 + $0x24] sm:$0xf]  ;;  %v620_v37 = vor.u32 %v736_v33, %v619_v32  ;;  %v611_v39 = vld [vmem:[%s989_s2 + $0x10] sm:$0xf]  ;;  %s600_s7 = sshll.u32 %s994_s19, 3 }
  0x14   : > { %v621_v36 = vld [vmem:[%s989_s2 + $0x28] sm:$0xf0]  ;;  %v734_v40 = vld [vmem:[%s989_s2 + $0x14] sm:$0xf0]  ;;  %v751_v41 = vld [vmem:[%s990_s3 + $0x20] sm:$0xff]  ;;  %s236_s10 = scalar_lea.vmem %s992_s5, %s600_s7 }
  0x15   : > { %432 = vmatpush.bf16.msra.mxu2 %v753_v27  ;;  %v624_v38 = vor.u32 %v735_v35, %v621_v36  ;;  %v733_v42 = vld [vmem:[%s989_s2 + $0x14] sm:$0xf]  ;;  %v613_v43 = vld [vmem:[%s989_s2 + $0x18] sm:$0xf0]  ;;  %v612_v44 = vor.u32 %v734_v40, %v611_v39  ;;  %v603_v46 = vld [vmem:[%s989_s2] sm:$0xf] }
  0x16   : > { %336 = vmatpush.bf16.msra.mxu0 %v644_v16  ;;  %v616_v45 = vor.u32 %v733_v42, %v613_v43  ;;  %v732_v47 = vld [vmem:[%s989_s2 + $0x4] sm:$0xf0]  ;;  %v731_v48 = vld [vmem:[%s989_s2 + $0x4] sm:$0xf]  ;;  %v605_v49 = vld [vmem:[%s989_s2 + $0x8] sm:$0xf0] }
  0x17   : > { %349 = vmatpush.bf16.msra.mxu1 %v648_v17  ;;  %v604_v50 = vor.u32 %v732_v47, %v603_v46  ;;  %v608_v51 = vor.u32 %v731_v48, %v605_v49  ;;  %v237_v52 = vld [vmem:[%s228_s26] sm:$0xf]  ;;  %v750_v53 = vld [vmem:[%s990_s3 + $0x18] sm:$0xff]  ;;  %v749_v54 = vld [vmem:[%s990_s3 + $0x10] sm:$0xff] }
  0x18   : > { %v748_v55 = vld [vmem:[%s990_s3 + $0x8] sm:$0xff]  ;;  %v747_v56 = vld [vmem:[%s990_s3] sm:$0xff]  ;;  %v762_v57 = vld [vmem:[%s991_s4 + $0x38] sm:$0xff] }
  0x19   : > { %433 = vmatpush.bf16.msra.mxu2 %v752_v34  ;;  %512 = vmatpush.bf16.msra.mxu3 %v762_v57  ;;  %v761_v58 = vld [vmem:[%s991_s4 + $0x30] sm:$0xff]  ;;  %v760_v59 = vld [vmem:[%s991_s4 + $0x28] sm:$0xff]  ;;  %v759_v60 = vld [vmem:[%s991_s4 + $0x20] sm:$0xff] }
  0x1a   : > { %337 = vmatpush.bf16.msra.mxu0 %v636_v23  ;;  %v758_v0 = vld [vmem:[%s991_s4 + $0x18] sm:$0xff]  ;;  %v757_v3 = vld [vmem:[%s991_s4 + $0x10] sm:$0xff]  ;;  %v756_v7 = vld [vmem:[%s991_s4 + $0x8] sm:$0xff] }
  0x1b   : > { %350 = vmatpush.bf16.msra.mxu1 %v640_v24  ;;  %v755_v11 = vld [vmem:[%s991_s4] sm:$0xff] }
  0x1c   : > { %v444_v12 = vld [vmem:[%s232_s6] sm:$0xf] }
  0x1d   : > { %434 = vmatpush.bf16.msra.mxu2 %v751_v41  ;;  %513 = vmatpush.bf16.msra.mxu3 %v761_v58  ;;  %v445_v13 = vunpack.c.l.bf16 %v444_v12 }
  0x1e   : > { %338 = vmatpush.bf16.msra.mxu0 %v628_v30 }
  0x1f   : > { %351 = vmatpush.bf16.msra.mxu1 %v632_v31 }
  0x21   : > { %435 = vmatpush.bf16.msra.mxu2 %v750_v53  ;;  %514 = vmatpush.bf16.msra.mxu3 %v760_v59 }
  0x22   : > { %339 = vmatpush.bf16.msra.mxu0 %v620_v37 }
  0x23   : > { %352 = vmatpush.bf16.msra.mxu1 %v624_v38 }
  0x25   : > { %436 = vmatpush.bf16.msra.mxu2 %v749_v54  ;;  %515 = vmatpush.bf16.msra.mxu3 %v759_v60 }
  0x26   : > { %340 = vmatpush.bf16.msra.mxu0 %v612_v44 }
  0x27   : > { %353 = vmatpush.bf16.msra.mxu1 %v616_v45 }
  0x29   : > { %437 = vmatpush.bf16.msra.mxu2 %v748_v55  ;;  %516 = vmatpush.bf16.msra.mxu3 %v758_v0 }
  0x2a   : > { %341 = vmatpush.bf16.msra.mxu0 %v604_v50 }
  0x2b   : > { %354 = vmatpush.bf16.msra.mxu1 %v608_v51 }
  0x2d   : > { %342 = vmatmul.bf16.vlgmr.msra.gmra.mxu0 %v237_v52  ;;  %438 = vmatpush.bf16.msra.mxu2 %v747_v56 }
  0x2e   : > { %355 = vmatmul.bf16.vlgmr.msra.gmra.mxu1 %v237_v52  ;;  %517 = vmatpush.bf16.msra.mxu3 %v757_v3 }
  0x32   : > { %518 = vmatpush.bf16.msra.mxu3 %v756_v7 }
  0x36   : > { %519 = vmatpush.bf16.msra.mxu3 %v755_v11 }
  0xaa   : > { %v343_v61 = vpop.f32.mrf.mxu0 }
  0xab   : > { %v360_v62 = vmul.f32 %v343_v61, %v343_v61  ;;  %v356_v63 = vpop.f32.mrf.mxu1 }
  0xac   : > { %v361_v1 = vmul.f32 %v356_v63, %v356_v63 }
  0xae   : > { %v362_v2 = vadd.f32 %v361_v1, %v360_v62 }
  0xb0   : > { %v363_v4 = vadd.f32 1e-14, %v362_v2 }
  0xb2   : > { %771 = vlog2.f32 %v363_v4  ;;  %v345_v5 = vpop.f32.mrf.mxu0 }
  0xb3   : > { %v358_v6 = vpop.f32.mrf.mxu1 }
  0xb8   : > { %v772_v8 = vpop.eup %771 }
  0xb9   : > { %v365_v9 = vmul.f32 0.6931472, %v772_v8 }
  0xbb   : > { %v366_v10 = vpack.c.bf16 %v365_v9, %v365_v9 }
  0xbd   : > { %439 = vmatmul.bf16.vlgmr.msra.gmra.mxu2 %v366_v10 }
 0x140   : > { %v440_v14 = vpop.f32.mrf.mxu2 }
 0x141   : > { %v446_v15 = vmul.f32 %v445_v13, %v440_v14 }
 0x143   : > { %v447_v16 = vpack.c.bf16 %v446_v15, %v446_v15 }
 0x145   : > { %520 = vmatmul.bf16.vlgmr.msra.gmra.mxu3 %v447_v16 }
 0x148   : > { %v442_v17 = vpop.f32.mrf.mxu2 }
 0x1c8   : > { %v521_v18 = vpop.f32.mrf.mxu3 }
 0x1c9   : > { %v525_v19 = vand.u32 2147483647, %v521_v18 }
 0x1cb   : > { %527 = vst [vmem:[%s236_s10] sm:$0xff] %v525_v19 }
 0x1d0   : > { %v523_v20 = vpop.f32.mrf.mxu3 }
 0x1d1 PF: > { %s15_s18 = sadd.s32 1, %s779_s18  }
 0x1d2   : > { %p12_p4 = scmp.ge.s32.totalorder %s15_s18, 4  }
 0x1d4   :  { %14 = sbr.rel (!%p12_p4) target bundleno = 1 (0x1), region = 73 }

</bundles_post_ra>
